<compile_context>
chip_gen: v5e
topology: v5e:2x2
jax: 0.10.0
libtpu: 0.0.40
codegen_flags: <defaults>
</compile_context>

<pallas_src>
import math
import functools

import jax
import jax.numpy as jnp
from jax.experimental import pallas as pl
from jax.experimental.pallas import tpu as pltpu


def lstm_cell_kernel(x_ref, hx_ref, cx_ref, wx_ref, wh_ref, b_ref, c2c_ref,
                     out_ref):
    """One fused LSTM-cell step for a (block_b,) batch tile.

    x_ref  : (bb, In)      hx_ref/cx_ref : (bb, H)
    wx_ref : (In, 4H)      wh_ref        : (H, 4H)
    b_ref  : (1, 4H)       c2c_ref       : (1, 3H)
    out_ref: (bb, 2H)  -> [hm | cy] slab
    """
    H = cx_ref.shape[-1]

    x = x_ref[...]
    hx = hx_ref[...]
    cx = cx_ref[...].astype(jnp.float32)

    # Hoisted, single reads of the small broadcast vectors (f32 math).
    b = b_ref[...].astype(jnp.float32)        # (1, 4H)
    c2c = c2c_ref[...].astype(jnp.float32)    # (1, 3H)

    # Two MXU pushes with a 4H-wide (lane-dense) output, f32 accumulation.
    gates = (jnp.dot(x, wx_ref[...], preferred_element_type=jnp.float32)
             + jnp.dot(hx, wh_ref[...], preferred_element_type=jnp.float32)
             + b)                              # (bb, 4H) f32

    i_pre = gates[:, 0 * H:1 * H]
    f_pre = gates[:, 1 * H:2 * H]
    g_pre = gates[:, 2 * H:3 * H]
    o_pre = gates[:, 3 * H:4 * H]

    ci = c2c[:, 0 * H:1 * H]
    cf = c2c[:, 1 * H:2 * H]
    co = c2c[:, 2 * H:3 * H]

    in_gate = jax.nn.sigmoid(i_pre + ci * cx)
    forget_gate = jax.nn.sigmoid(f_pre + cf * cx)
    cell_gate = forget_gate * cx + in_gate * jnp.tanh(g_pre)
    out_gate = jax.nn.sigmoid(o_pre + co * cell_gate)
    hm = out_gate * jnp.tanh(cell_gate)

    # Single lane-dense store of [hm | cy].
    out_ref[...] = jnp.concatenate([hm, cell_gate], axis=-1).astype(out_ref.dtype)


def lstm_cell(x, hx, cx, wx_all, wh_all, b_all, c2c, *, block_b=None,
              compute_dtype=None):
    """Fused LSTM cell. Returns (hm, cy), each (B, H) in x.dtype."""
    B, in_size = x.shape
    H = hx.shape[1]
    out_dtype = x.dtype

    # Optional reduced-precision matmul operands (bf16 on v6e/v7x).
    if compute_dtype is not None:
        x = x.astype(compute_dtype)
        hx = hx.astype(compute_dtype)
        wx_all = wx_all.astype(compute_dtype)
        wh_all = wh_all.astype(compute_dtype)

    # Fill the MXU M dimension: whole batch in one block for small B,
    # otherwise 256-row tiles (multiple of 8 for f32 / 16 for bf16).
    if block_b is None:
        block_b = B if B <= 256 else 256
    grid = (pl.cdiv(B, block_b),)

    # Explicit scoped-VMEM sizing from the tile footprint (x2 for the
    # runtime's double buffering) with floor/cap for all generations.
    itemsize = jnp.dtype(x.dtype).itemsize
    weight_elems = (in_size + H) * 4 * H + 4 * H + 3 * H
    act_elems = block_b * (in_size + 2 * H)
    out_elems = block_b * 2 * H
    vmem_bytes = 2 * (weight_elems + act_elems + out_elems) * itemsize + (1 << 20)
    vmem_limit = int(min(64 << 20, max(8 << 20, vmem_bytes)))

    const = lambda shape: pl.BlockSpec(shape, lambda i: (0,) * len(shape))
    batched = lambda last: pl.BlockSpec((block_b, last), lambda i: (i, 0))

    out = pl.pallas_call(
        lstm_cell_kernel,
        out_shape=jax.ShapeDtypeStruct((B, 2 * H), out_dtype),
        grid_spec=pltpu.PrefetchScalarGridSpec(
            num_scalar_prefetch=0,
            grid=grid,
            in_specs=[
                batched(in_size),           # x
                batched(H),                 # hx
                batched(H),                 # cx
                const((in_size, 4 * H)),    # fused x2h weights [In, 4H]
                const((H, 4 * H)),          # fused h2h weights [H, 4H]
                const((1, 4 * H)),          # combined bias (x2h + h2h)
                const((1, 3 * H)),          # peephole c2c (ci|cf|co)
            ],
            out_specs=batched(2 * H),       # [hm | cy] slab
        ),
        compiler_params=pltpu.CompilerParams(
            dimension_semantics=("parallel",),
            vmem_limit_bytes=vmem_limit,
        ),
    )(x, hx, cx, wx_all, wh_all, b_all, c2c)

    return out[:, :H], out[:, H:]


def init_params(key, input_size, hidden_size, dtype=jnp.float32):
    """Deterministic uniform(-std, std) init, matching reset_parameters().

    Returns kernel-layout params:
      wx_all [In, 4H], wh_all [H, 4H], b_all [1, 4H], c2c [1, 3H].
    Gate order along the 4H axis is (i, f, g, o), matching gates.chunk(4, 1).
    """
    std = 1.0 / math.sqrt(hidden_size)
    ks = jax.random.split(key, 5)
    # PyTorch Linear weight layout is (out_features, in_features) = (4H, In).
    w_x2h = jax.random.uniform(ks[0], (4 * hidden_size, input_size), dtype,
                               -std, std)
    b_x2h = jax.random.uniform(ks[1], (4 * hidden_size,), dtype, -std, std)
    w_h2h = jax.random.uniform(ks[2], (4 * hidden_size, hidden_size), dtype,
                               -std, std)
    b_h2h = jax.random.uniform(ks[3], (4 * hidden_size,), dtype, -std, std)
    c2c = jax.random.uniform(ks[4], (3 * hidden_size,), dtype, -std, std)

    wx_all = w_x2h.T                                  # (In, 4H)
    wh_all = w_h2h.T                                  # (H, 4H)
    b_all = (b_x2h + b_h2h).reshape(1, 4 * hidden_size)
    c2c_k = c2c.reshape(1, 3 * hidden_size)
    return wx_all, wh_all, b_all, c2c_k


def reference_lstm_cell(x, hx, cx, wx_all, wh_all, b_all, c2c):
    """Plain-JAX reference mirroring the PyTorch forward."""
    H = hx.shape[1]
    gates = x @ wx_all + hx @ wh_all + b_all
    i_pre, f_pre, g_pre, o_pre = jnp.split(gates, 4, axis=1)
    ci, cf, co = jnp.split(c2c, 3, axis=1)
    in_gate = jax.nn.sigmoid(i_pre + ci * cx)
    forget_gate = jax.nn.sigmoid(f_pre + cf * cx)
    cell_gate = forget_gate * cx + in_gate * jnp.tanh(g_pre)
    out_gate = jax.nn.sigmoid(o_pre + co * cell_gate)
    return out_gate * jnp.tanh(cell_gate), cell_gate


if __name__ == "__main__":
    batch = 16
    input_size = 16
    hidden_size = 32
    dtype = jnp.float32

    key = jax.random.PRNGKey(0)
    k_param, k_x, k_h, k_c = jax.random.split(key, 4)

    wx_all, wh_all, b_all, c2c = init_params(k_param, input_size, hidden_size,
                                             dtype)
    x = jax.random.normal(k_x, (batch, input_size), dtype)
    hx = jax.random.normal(k_h, (batch, hidden_size), dtype)
    cx = jax.random.normal(k_c, (batch, hidden_size), dtype)

    hm, cy = lstm_cell(x, hx, cx, wx_all, wh_all, b_all, c2c)
    jax.block_until_ready((hm, cy))

    hm_ref, cy_ref = reference_lstm_cell(x, hx, cx, wx_all, wh_all, b_all, c2c)
    assert jnp.allclose(hm, hm_ref, atol=1e-5, rtol=1e-5)
    assert jnp.allclose(cy, cy_ref, atol=1e-5, rtol=1e-5)

    print("KERNEL_OK")
</pallas_src>

<mosaic_0001>
module attributes {stable_mosaic.version = 11 : i64} {
  func.func @lstm_cell_kernel(%arg0: i32, %arg1: memref<16x16xf32, #tpu.memory_space<vmem>>, %arg2: memref<16x32xf32, #tpu.memory_space<vmem>>, %arg3: memref<16x32xf32, #tpu.memory_space<vmem>>, %arg4: memref<16x128xf32, #tpu.memory_space<vmem>>, %arg5: memref<32x128xf32, #tpu.memory_space<vmem>>, %arg6: memref<1x128xf32, #tpu.memory_space<vmem>>, %arg7: memref<1x96xf32, #tpu.memory_space<vmem>>, %arg8: memref<16x64xf32, #tpu.memory_space<vmem>>) attributes {dimension_semantics = [#tpu.dimension_semantics<parallel>], iteration_bounds = array<i64: 1>, scalar_prefetch = 0 : i64, scratch_operands = 0 : i64, tpu.core_type = #tpu.core_type<tc>, window_params = [{transform_indices = @transform_0, window_bounds = array<i64: 16, 16>}, {transform_indices = @transform_1, window_bounds = array<i64: 16, 32>}, {transform_indices = @transform_2, window_bounds = array<i64: 16, 32>}, {pipeline_mode = #tpu.pipeline_mode<synchronous>, transform_indices = @transform_3, window_bounds = array<i64: 16, 128>}, {pipeline_mode = #tpu.pipeline_mode<synchronous>, transform_indices = @transform_4, window_bounds = array<i64: 32, 128>}, {pipeline_mode = #tpu.pipeline_mode<synchronous>, transform_indices = @transform_5, window_bounds = array<i64: 1, 128>}, {pipeline_mode = #tpu.pipeline_mode<synchronous>, transform_indices = @transform_6, window_bounds = array<i64: 1, 96>}, {transform_indices = @transform_7, window_bounds = array<i64: 16, 64>}]} {
    %c0 = arith.constant 0 : index
    %c0_0 = arith.constant 0 : index
    %0 = vector.load %arg1[%c0, %c0_0] : memref<16x16xf32, #tpu.memory_space<vmem>>, vector<16x16xf32>
    %c0_1 = arith.constant 0 : index
    %c0_2 = arith.constant 0 : index
    %1 = vector.load %arg2[%c0_1, %c0_2] : memref<16x32xf32, #tpu.memory_space<vmem>>, vector<16x32xf32>
    %c0_3 = arith.constant 0 : index
    %c0_4 = arith.constant 0 : index
    %2 = vector.load %arg3[%c0_3, %c0_4] : memref<16x32xf32, #tpu.memory_space<vmem>>, vector<16x32xf32>
    %c0_5 = arith.constant 0 : index
    %c0_6 = arith.constant 0 : index
    %3 = vector.load %arg6[%c0_5, %c0_6] : memref<1x128xf32, #tpu.memory_space<vmem>>, vector<1x128xf32>
    %c0_7 = arith.constant 0 : index
    %c0_8 = arith.constant 0 : index
    %4 = vector.load %arg7[%c0_7, %c0_8] : memref<1x96xf32, #tpu.memory_space<vmem>>, vector<1x96xf32>
    %c0_9 = arith.constant 0 : index
    %c0_10 = arith.constant 0 : index
    %5 = vector.load %arg4[%c0_9, %c0_10] : memref<16x128xf32, #tpu.memory_space<vmem>>, vector<16x128xf32>
    %cst = arith.constant dense<0.000000e+00> : vector<16x128xf32>
    %6 = tpu.matmul %0, %5, %cst {dimension_numbers = #tpu.dot_dimension_numbers<[1], [0], [0], [1], [0, 0, 1, 1], [], []>} : vector<16x16xf32>, vector<16x128xf32>, vector<16x128xf32> -> vector<16x128xf32>
    %c0_11 = arith.constant 0 : index
    %c0_12 = arith.constant 0 : index
    %7 = vector.load %arg5[%c0_11, %c0_12] : memref<32x128xf32, #tpu.memory_space<vmem>>, vector<32x128xf32>
    %cst_13 = arith.constant dense<0.000000e+00> : vector<16x128xf32>
    %8 = tpu.matmul %1, %7, %cst_13 {dimension_numbers = #tpu.dot_dimension_numbers<[1], [0], [0], [1], [0, 0, 1, 1], [], []>} : vector<16x32xf32>, vector<32x128xf32>, vector<16x128xf32> -> vector<16x128xf32>
    %9 = arith.addf %6, %8 : vector<16x128xf32>
    %10 = vector.broadcast %3 : vector<1x128xf32> to vector<16x128xf32>
    %11 = arith.addf %9, %10 : vector<16x128xf32>
    %12 = vector.extract_strided_slice %11 {offsets = [0, 0], sizes = [16, 32], strides = [1, 1]} : vector<16x128xf32> to vector<16x32xf32>
    %13 = vector.extract_strided_slice %11 {offsets = [0, 32], sizes = [16, 32], strides = [1, 1]} : vector<16x128xf32> to vector<16x32xf32>
    %14 = vector.extract_strided_slice %11 {offsets = [0, 64], sizes = [16, 32], strides = [1, 1]} : vector<16x128xf32> to vector<16x32xf32>
    %15 = vector.extract_strided_slice %11 {offsets = [0, 96], sizes = [16, 32], strides = [1, 1]} : vector<16x128xf32> to vector<16x32xf32>
    %16 = vector.extract_strided_slice %4 {offsets = [0, 0], sizes = [1, 32], strides = [1, 1]} : vector<1x96xf32> to vector<1x32xf32>
    %17 = vector.extract_strided_slice %4 {offsets = [0, 32], sizes = [1, 32], strides = [1, 1]} : vector<1x96xf32> to vector<1x32xf32>
    %18 = vector.extract_strided_slice %4 {offsets = [0, 64], sizes = [1, 32], strides = [1, 1]} : vector<1x96xf32> to vector<1x32xf32>
    %19 = vector.broadcast %16 : vector<1x32xf32> to vector<16x32xf32>
    %20 = arith.mulf %19, %2 : vector<16x32xf32>
    %21 = arith.addf %12, %20 : vector<16x32xf32>
    %22 = arith.negf %21 : vector<16x32xf32>
    %23 = math.exp %22 : vector<16x32xf32>
    %cst_14 = arith.constant 1.000000e+00 : f32
    %24 = vector.broadcast %cst_14 : f32 to vector<16x32xf32>
    %25 = arith.addf %24, %23 : vector<16x32xf32>
    %26 = arith.divf %24, %25 : vector<16x32xf32>
    %27 = vector.broadcast %17 : vector<1x32xf32> to vector<16x32xf32>
    %28 = arith.mulf %27, %2 : vector<16x32xf32>
    %29 = arith.addf %13, %28 : vector<16x32xf32>
    %30 = arith.negf %29 : vector<16x32xf32>
    %31 = math.exp %30 : vector<16x32xf32>
    %cst_15 = arith.constant 1.000000e+00 : f32
    %32 = vector.broadcast %cst_15 : f32 to vector<16x32xf32>
    %33 = arith.addf %32, %31 : vector<16x32xf32>
    %34 = arith.divf %32, %33 : vector<16x32xf32>
    %35 = arith.mulf %34, %2 : vector<16x32xf32>
    %36 = math.tanh %14 : vector<16x32xf32>
    %37 = arith.mulf %26, %36 : vector<16x32xf32>
    %38 = arith.addf %35, %37 : vector<16x32xf32>
    %39 = vector.broadcast %18 : vector<1x32xf32> to vector<16x32xf32>
    %40 = arith.mulf %39, %38 : vector<16x32xf32>
    %41 = arith.addf %15, %40 : vector<16x32xf32>
    %42 = arith.negf %41 : vector<16x32xf32>
    %43 = math.exp %42 : vector<16x32xf32>
    %cst_16 = arith.constant 1.000000e+00 : f32
    %44 = vector.broadcast %cst_16 : f32 to vector<16x32xf32>
    %45 = arith.addf %44, %43 : vector<16x32xf32>
    %46 = arith.divf %44, %45 : vector<16x32xf32>
    %47 = math.tanh %38 : vector<16x32xf32>
    %48 = arith.mulf %46, %47 : vector<16x32xf32>
    %49 = tpu.concatenate %48, %38 in 1 : vector<16x32xf32>, vector<16x32xf32> -> vector<16x64xf32>
    %c0_17 = arith.constant 0 : index
    %c0_18 = arith.constant 0 : index
    %50 = vector.load %arg8[%c0_17, %c0_18] : memref<16x64xf32, #tpu.memory_space<vmem>>, vector<16x64xf32>
    tpu.vector_store %arg8[%c0_17, %c0_18], %49 {strides = array<i32>} : memref<16x64xf32, #tpu.memory_space<vmem>>, vector<16x64xf32>,
    return
  }
  func.func @transform_0(%arg0: i32) -> (i32, i32) {
    %c0_i32 = arith.constant 0 : i32
    %c0_i32_0 = arith.constant 0 : i32
    return %arg0, %c0_i32 : i32, i32
  }
  func.func @transform_1(%arg0: i32) -> (i32, i32) {
    %c0_i32 = arith.constant 0 : i32
    %c0_i32_0 = arith.constant 0 : i32
    return %arg0, %c0_i32 : i32, i32
  }
  func.func @transform_2(%arg0: i32) -> (i32, i32) {
    %c0_i32 = arith.constant 0 : i32
    %c0_i32_0 = arith.constant 0 : i32
    return %arg0, %c0_i32 : i32, i32
  }
  func.func @transform_3(%arg0: i32) -> (i32, i32) {
    %c0_i32 = arith.constant 0 : i32
    %c0_i32_0 = arith.constant 0 : i32
    %c0_i32_1 = arith.constant 0 : i32
    return %c0_i32, %c0_i32_0 : i32, i32
  }
  func.func @transform_4(%arg0: i32) -> (i32, i32) {
    %c0_i32 = arith.constant 0 : i32
    %c0_i32_0 = arith.constant 0 : i32
    %c0_i32_1 = arith.constant 0 : i32
    return %c0_i32, %c0_i32_0 : i32, i32
  }
  func.func @transform_5(%arg0: i32) -> (i32, i32) {
    %c0_i32 = arith.constant 0 : i32
    %c0_i32_0 = arith.constant 0 : i32
    %c0_i32_1 = arith.constant 0 : i32
    return %c0_i32, %c0_i32_0 : i32, i32
  }
  func.func @transform_6(%arg0: i32) -> (i32, i32) {
    %c0_i32 = arith.constant 0 : i32
    %c0_i32_0 = arith.constant 0 : i32
    %c0_i32_1 = arith.constant 0 : i32
    return %c0_i32, %c0_i32_0 : i32, i32
  }
  func.func @transform_7(%arg0: i32) -> (i32, i32) {
    %c0_i32 = arith.constant 0 : i32
    %c0_i32_0 = arith.constant 0 : i32
    return %arg0, %c0_i32 : i32, i32
  }
}

</mosaic_0001>

<bundles_post_ra>
// kernel: tpu_custom_call.1
= control target key start
LH: loop header
LB: loop body
LE: loop exit
PB: predicated region body
PF: predicated region fallthrough
CT: control target
= control target key end

     0   :  { %12 = vsyncpa [#allocation3], 0  ;;  %s759_s0 = inlined_call_operand.hbm [shape: f32[16,16], index: 0, kind: input, shape index: {}]   ;;  %s760_s1 = inlined_call_operand.hbm [shape: f32[16,32], index: 1, kind: input, shape index: {}]   ;;  %s761_s2 = inlined_call_operand.hbm [shape: f32[16,32], index: 2, kind: input, shape index: {}]   ;;  %s762_s3 = inlined_call_operand.hbm [shape: f32[16,128], index: 3, kind: input, shape index: {}]   ;;  %s763_s4 = inlined_call_operand.hbm [shape: f32[32,128], index: 4, kind: input, shape index: {}]   ;;  %s764_s5 = inlined_call_operand.vmem [shape: f32[1,128], index: 5, kind: input, shape index: {}]   ;;  %s765_s6 = inlined_call_operand.vmem [shape: f32[1,96], index: 6, kind: input, shape index: {}]   ;;  %s766_s7 = inlined_call_operand.hbm [shape: f32[16,64], index: 7, kind: output, shape index: {}]  }
   0x1   :  { %13 = vsyncpa [#allocation6], 0 }
   0x2   :  { %14 = vsyncpa [#allocation9], 0 }
   0x3   :  { %15 = vsyncpa [#allocation4], 0  ;;  %s33_s26 = sshll.u32 %s760_s1, 4  ;;  %s619_s27 = smov [#allocation5]   ;;  %s34_s26 = int_to_ptr.hbm [resolvable:$true] %s33_s26 }
   0x4   :  { %s35_s28 = sshll.u32 %s619_s27, 4  ;;  %s59_s8 = sshll.u32 %s762_s3, 4  ;;  %s36_s28 = int_to_ptr.vmem [resolvable:$true] %s35_s28  ;;  %s60_s8 = int_to_ptr.hbm [resolvable:$true] %s59_s8 }
   0x5   :  { %s620_s9 = smov 128   ;;  %s621_s10 = smov 8  }
   0x6   :  { %41 = dma.hbm_to_vmem [thread:$0]  %s34_s26, 256, %s36_s28, [#allocation6], %s620_s9, %s620_s9, %s621_s10  }
   0x7   :  { %s622_s11 = smov [#allocation8]   ;;  %s20_s1 = sshll.u32 %s759_s0, 4  ;;  %s21_s1 = int_to_ptr.hbm [resolvable:$true] %s20_s1 }
   0x8   :  { %s61_s12 = sshll.u32 %s622_s11, 4  ;;  %s46_s16 = sshll.u32 %s761_s2, 4  ;;  %s62_s12 = int_to_ptr.vmem [resolvable:$true] %s61_s12  ;;  %s47_s16 = int_to_ptr.hbm [resolvable:$true] %s46_s16 }
   0x9   :  { %67 = dma.hbm_to_vmem [thread:$0]  %s60_s8, 256, %s62_s12, [#allocation9], %s620_s9, %s620_s9, %s621_s10  }
   0xa   :  { %s623_s17 = smov [#allocation2]   ;;  %s624_s19 = smov [#allocation7]  }
   0xb   :  { %s22_s18 = sshll.u32 %s623_s17, 4  ;;  %s48_s0 = sshll.u32 %s624_s19, 4  ;;  %s23_s18 = int_to_ptr.vmem [resolvable:$true] %s22_s18  ;;  %s49_s0 = int_to_ptr.vmem [resolvable:$true] %s48_s0 }
   0xc   :  { %28 = dma.hbm_to_vmem [thread:$0]  %s21_s1, 256, %s23_s18, [#allocation3], %s620_s9, %s620_s9, %s621_s10  }
   0xd   :  { %s72_s22 = sshll.u32 %s763_s4, 4  ;;  %s625_s2 = smov [#allocation10]   ;;  %s73_s22 = int_to_ptr.hbm [resolvable:$true] %s72_s22 }
   0xe   :  { %54 = dma.hbm_to_vmem [thread:$0]  %s47_s16, 256, %s49_s0, [#allocation6], %s620_s9, %s620_s9, %s621_s10  }
   0xf   :  { %s74_s23 = sshll.u32 %s625_s2, 4  ;;  %s75_s23 = int_to_ptr.vmem [resolvable:$true] %s74_s23 }
  0x10   :  { %80 = dma.hbm_to_vmem [thread:$0]  %s73_s22, 512, %s75_s23, [#allocation9], %s620_s9, %s620_s9, %s621_s10  }
  0x11   :  { %611 = dma.done.wait [#allocation3], 256  }
  0x12   :  { %612 = vsyncadd [#allocation3], 4294967040 }
  0x13   :  { %613 = dma.done.wait [#allocation6], 512  }
  0x14   :  { %614 = vsyncadd [#allocation6], 4294966784 }
  0x15   :  { %615 = dma.done.wait [#allocation9], 768  }
  0x16   :  { %616 = vsyncadd [#allocation9], 4294966528  ;;  %v118_v0 = vld [vmem:[#allocation10 + $0x18] sm:$0xff]  ;;  %v117_v1 = vld [vmem:[#allocation10 + $0x10] sm:$0xff]  ;;  %vm149_vm0 = vcmask 130048   ;;  %vm119_vm1 = vcmask 261120  }
  0x17   :  { %138 = vmatpush.msra.mxu0 %v118_v0  ;;  %417 = vmatpush.msra.mxu2 %v118_v0  ;;  %v114_v2 = vld [vmem:[#allocation8 + $0x8] sm:$0xff]  ;;  %v113_v3 = vld [vmem:[#allocation8] sm:$0xff]  ;;  %v116_v4 = vld [vmem:[#allocation10 + $0x8] sm:$0xff]  ;;  %s626_s4 = smov 32   ;;  %s627_s26 = smov 64  }
  0x18   :  { %170 = vmatpush.msra.mxu1 %v114_v2  ;;  %421 = vmatpush.msra.mxu3 %v114_v2  ;;  %v105_v5 = vld [vmem:[#allocation2] sm:$0xff]  ;;  %v106_v6 = vld [vmem:[#allocation2 + $0x8] sm:$0xff]  ;;  %v107_v8 = vld [vmem:[#allocation5] sm:$0xff]  ;;  %s392_s8 = sshll.u32 %s766_s7, 4  ;;  %s393_s8 = int_to_ptr.hbm [resolvable:$true] %s392_s8 }
  0x19   :  { %139 = vmatpush.msra.mxu0 %v117_v1  ;;  %418 = vmatpush.msra.mxu2 %v117_v1  ;;  %v115_v7 = vld [vmem:[#allocation10] sm:$0xff]  ;;  %v108_v9 = vld [vmem:[#allocation5 + $0x8] sm:$0xff]  ;;  %v110_v11 = vld [vmem:[#allocation7 + $0x8] sm:$0xff] }
  0x1a   :  { %171 = vmatpush.msra.mxu1 %v113_v3  ;;  %422 = vmatpush.msra.mxu3 %v113_v3  ;;  %v109_v10 = vld [vmem:[#allocation7] sm:$0xff] }
  0x1b   :  { %140 = vmatpush.msra.mxu0 %v116_v4  ;;  %419 = vmatpush.msra.mxu2 %v116_v4  ;;  %v434_v13 = vld [vmem:[%s764_s5] ss:$0 sm:$0xff] }
  0x1c   :  { %409 = vmatmul.msk.f32.vlgmr.msra.gmra.mxu1 %vm149_vm0, %v105_v5  ;;  %410 = vmatmul.msk.f32.vlgmr.msra.gmra.mxu3 %vm149_vm0, %v106_v6  ;;  %v717_v23 = vld [vmem:[%s765_s6] ss:$0 sm:$0xff]  ;;  %s628_s6 = smov [#allocation11]  }
  0x1d   :  { %141 = vmatpush.msra.mxu0 %v115_v7  ;;  %420 = vmatpush.msra.mxu2 %v115_v7  ;;  %v187_v24 = vmul.f32 %v717_v23, %v109_v10  ;;  %v188_v26 = vmul.f32 %v717_v23, %v110_v11  ;;  %s390_s28 = sshll.u32 %s628_s6, 4  ;;  %s391_s28 = int_to_ptr.vmem [resolvable:$true] %s390_s28 }
  0x1e   :  { %407 = vmatmul.msk.f32.vlgmr.msra.gmra.mxu0 %vm119_vm1, %v107_v8  ;;  %408 = vmatmul.msk.f32.vlgmr.msra.gmra.mxu2 %vm119_vm1, %v108_v9 }
  0x1f   :  { %231 = vrot.lane.b32.xlu1 %v109_v10, %s626_s4 }
  0x27   :  { %233 = vrot.lane.b32.xlu1 %v110_v11, %s626_s4 }
  0x91   :  { %v232_v58 = vpop.permute.xlu1 %231 }
  0x92   :  { %v237_v59 = vmul.f32 %v717_v23, %v232_v58 }
  0x99   :  { %v173_v12 = vpop.f32.mrf.mxu1  ;;  %v234_v61 = vpop.permute.xlu1 %233 }
  0x9a   :  { %v238_v63 = vmul.f32 %v717_v23, %v234_v61 }
  0x9b   :  { %v143_v14 = vpop.f32.mrf.mxu0 }
  0x9c   :  { %v174_v15 = vadd.f32 %v173_v12, %v143_v14 }
  0x9e   :  { %v706_v16 = vadd.f32 %v434_v13, %v174_v15 }
  0x9f   :  { %v176_v17 = vpop.f32.mrf.mxu3 }
  0xa0   :  { %435 = vtanh.f32 %v706_v16  ;;  %v189_v25 = vadd.f32 %v187_v24, %v706_v16  ;;  %v239_v60 = vadd.f32 %v237_v59, %v706_v16 }
  0xa1   :  { %v146_v18 = vpop.f32.mrf.mxu2 }
  0xa2   :  { %v177_v19 = vadd.f32 %v176_v17, %v146_v18  ;;  %v411_v27 = vmul.f32 -1.442695, %v189_v25  ;;  %v413_v62 = vmul.f32 -1.442695, %v239_v60 }
  0xa4   :  { %v709_v20 = vadd.f32 %v434_v13, %v177_v19 }
  0xa6   :  { %v436_v21 = vpop.eup %435  ;;  %437 = vtanh.f32 %v709_v20  ;;  %v190_v28 = vadd.f32 %v188_v26, %v709_v20  ;;  %v240_v0 = vadd.f32 %v238_v63, %v709_v20 }
  0xa7   :  { %285 = vrot.lane.b32.xlu0 %v436_v21, %s627_s26  ;;  %439 = vpow2.f32 %v411_v27 }
  0xa8   :  { %v412_v29 = vmul.f32 -1.442695, %v190_v28  ;;  %v414_v1 = vmul.f32 -1.442695, %v240_v0 }
  0xaa   :  { %441 = vpow2.f32 %v412_v29 }
  0xac   :  { %v438_v22 = vpop.eup %437 }
  0xad   :  { %v440_v30 = vpop.eup %439 }
  0xae   :  { %v197_v31 = vadd.f32 1.0, %v440_v30 }
  0xaf   :  { %287 = vrot.lane.b32.xlu0 %v438_v22, %s627_s26 }
  0xb0   :  { %443 = vrcp.f32 %v197_v31  ;;  %v442_v32 = vpop.eup %441  ;;  %v210_v42 = vand.u32 2147483648, %v197_v31  ;;  %vm204_vm3 = vweird.f32 %v197_v31  ;;  %v208_v43 = vand.u32 2147483647, %v197_v31 }
  0xb1   :  { %v198_v33 = vadd.f32 1.0, %v442_v32 }
  0xb2   :  { %v211_v46 = vor.u32 1.1754944e-38, %v210_v42  ;;  %vm209_vm5 = vcmp.eq.f32.partialorder %v208_v43, 8.507059e+37 }
  0xb3   :  { %445 = vrcp.f32 %v198_v33  ;;  %v225_v51 = vand.u32 2147483648, %v198_v33  ;;  %vm219_vm7 = vweird.f32 %v198_v33  ;;  %v223_v52 = vand.u32 2147483647, %v198_v33 }
  0xb4   :  { %447 = vpow2.f32 %v413_v62 }
  0xb5   :  { %v226_v54 = vor.u32 1.1754944e-38, %v225_v51  ;;  %vm224_vm9 = vcmp.eq.f32.partialorder %v223_v52, 8.507059e+37  ;;  %449 = vpow2.f32 %v414_v1 }
  0xb6   :  { %v444_v34 = vpop.eup %443 }
  0xb7   :  { %v200_v35 = vmul.f32 %v444_v34, %v197_v31  ;;  %vm205_vm2 = vweird.f32 %v444_v34 }
  0xb8   :  { %vm206_vm4 = vmor %vm204_vm3, %vm205_vm2 }
  0xb9   :  { %v201_v36 = vsub.f32 1.0, %v200_v35  ;;  %v446_v37 = vpop.eup %445 }
  0xba   :  { %v215_v39 = vmul.f32 %v446_v37, %v198_v33  ;;  %vm220_vm6 = vweird.f32 %v446_v37  ;;  %v448_v2 = vpop.eup %447 }
  0xbb   :  { %v202_v38 = vmul.f32 %v444_v34, %v201_v36  ;;  %vm221_vm8 = vmor %vm219_vm7, %vm220_vm6  ;;  %v247_v3 = vadd.f32 1.0, %v448_v2  ;;  %v450_v4 = vpop.eup %449 }
  0xbc   :  { %v216_v41 = vsub.f32 1.0, %v215_v39  ;;  %v248_v5 = vadd.f32 1.0, %v450_v4 }
  0xbd   :  { %v203_v40 = vadd.f32 %v444_v34, %v202_v38  ;;  %451 = vrcp.f32 %v247_v3  ;;  %v260_v14 = vand.u32 2147483648, %v247_v3  ;;  %vm254_vm11 = vweird.f32 %v247_v3 }
  0xbe   :  { %v217_v45 = vmul.f32 %v446_v37, %v216_v41  ;;  %453 = vrcp.f32 %v248_v5  ;;  %v258_v15 = vand.u32 2147483647, %v247_v3  ;;  %v275_v24 = vand.u32 2147483648, %v248_v5 }
  0xbf   :  { %v207_v44 = vsel %vm206_vm4, %v444_v34, %v203_v40  ;;  %v261_v19 = vor.u32 1.1754944e-38, %v260_v14  ;;  %vm269_vm15 = vweird.f32 %v248_v5  ;;  %v273_v25 = vand.u32 2147483647, %v248_v5 }
  0xc0   :  { %v212_v48 = vsel %vm209_vm5, %v211_v46, %v207_v44  ;;  %v218_v50 = vadd.f32 %v446_v37, %v217_v45  ;;  %vm259_vm13 = vcmp.eq.f32.partialorder %v258_v15, 8.507059e+37  ;;  %v276_v30 = vor.u32 1.1754944e-38, %v275_v24 }
  0xc1   :  { %vm274_vm2 = vcmp.eq.f32.partialorder %v273_v25, 8.507059e+37 }
  0xc2   :  { %v222_v53 = vsel %vm221_vm8, %v446_v37, %v218_v50 }
  0xc3   :  { %v227_v55 = vsel %vm224_vm9, %v226_v54, %v222_v53  ;;  %v452_v6 = vpop.eup %451 }
  0xc4   :  { %v250_v7 = vmul.f32 %v452_v6, %v247_v3  ;;  %v454_v9 = vpop.eup %453  ;;  %vm255_vm10 = vweird.f32 %v452_v6 }
  0xc5   :  { %v265_v10 = vmul.f32 %v454_v9, %v248_v5  ;;  %vm256_vm12 = vmor %vm254_vm11, %vm255_vm10  ;;  %vm270_vm14 = vweird.f32 %v454_v9  ;;  %vm383_vm11 = vcmask 523264  }
  0xc6   :  { %v251_v8 = vsub.f32 1.0, %v250_v7  ;;  %vm271_vm0 = vmor %vm269_vm15, %vm270_vm14 }
  0xc7   :  { %v266_v12 = vsub.f32 1.0, %v265_v10 }
  0xc8   :  { %v252_v11 = vmul.f32 %v452_v6, %v251_v8 }
  0xc9   :  { %v267_v17 = vmul.f32 %v454_v9, %v266_v12 }
  0xca   :  { %v253_v13 = vadd.f32 %v452_v6, %v252_v11 }
  0xcb   :  { %v268_v22 = vadd.f32 %v454_v9, %v267_v17 }
  0xcc   :  { %v257_v18 = vsel %vm256_vm12, %v452_v6, %v253_v13 }
  0xcd   :  { %v262_v21 = vsel %vm259_vm13, %v261_v19, %v257_v18  ;;  %v272_v28 = vsel %vm271_vm0, %v454_v9, %v268_v22 }
  0xce   :  { %v279_v26 = vmul.f32 %v262_v21, %v232_v58  ;;  %v277_v31 = vsel %vm274_vm2, %v276_v30, %v272_v28 }
  0xcf   :  { %v280_v32 = vmul.f32 %v277_v31, %v234_v61 }
 0x119   :  { %v286_v47 = vpop.permute.xlu0 %285 }
 0x11a   :  { %v291_v49 = vmul.f32 %v286_v47, %v212_v48 }
 0x11c   :  { %295 = vrot.lane.b32.xlu2 %v291_v49, %s626_s4 }
 0x121   :  { %v288_v56 = vpop.permute.xlu0 %287 }
 0x122   :  { %v292_v57 = vmul.f32 %v288_v56, %v227_v55 }
 0x124   :  { %297 = vrot.lane.b32.xlu2 %v292_v57, %s626_s4 }
 0x176   :  { %v296_v27 = vpop.permute.xlu2 %295 }
 0x177   :  { %v729_v29 = vadd.f32 %v296_v27, %v279_v26 }
 0x179   :  { %305 = vrot.lane.b32.xlu0 %v729_v29, %s626_s4  ;;  %455 = vtanh.f32 %v729_v29 }
 0x17e   :  { %v298_v33 = vpop.permute.xlu2 %297 }
 0x17f   :  { %v733_v34 = vadd.f32 %v298_v33, %v280_v32  ;;  %v456_v35 = vpop.eup %455 }
 0x181   :  { %307 = vrot.lane.b32.xlu1 %v733_v34, %s626_s4  ;;  %457 = vtanh.f32 %v733_v34 }
 0x187   :  { %v458_v40 = vpop.eup %457 }
 0x189   :  { %365 = vrot.lane.b32.xlu1 %v456_v35, %s627_s26 }
 0x1eb   :  { %v306_v36 = vpop.permute.xlu0 %305 }
 0x1ec   :  { %v311_v37 = vmul.f32 %v717_v23, %v306_v36 }
 0x1ee   :  { %315 = vrot.lane.b32.xlu2 %v311_v37, %s626_s4 }
 0x1f3   :  { %v308_v38 = vpop.permute.xlu1 %307 }
 0x1f4   :  { %v312_v39 = vmul.f32 %v717_v23, %v308_v38 }
 0x1f6   :  { %317 = vrot.lane.b32.xlu0 %v312_v39, %s626_s4  ;;  %367 = vrot.lane.b32.xlu2 %v458_v40, %s627_s26 }
 0x1fb   :  { %v366_v54 = vpop.permute.xlu1 %365 }
 0x248   :  { %v316_v41 = vpop.permute.xlu2 %315 }
 0x249   :  { %v321_v42 = vadd.f32 %v316_v41, %v706_v16 }
 0x24b   :  { %v415_v43 = vmul.f32 -1.442695, %v321_v42 }
 0x24d   :  { %459 = vpow2.f32 %v415_v43 }
 0x253   :  { %v460_v44 = vpop.eup %459 }
 0x254   :  { %v329_v45 = vadd.f32 1.0, %v460_v44 }
 0x256   :  { %461 = vrcp.f32 %v329_v45  ;;  %v342_v49 = vand.u32 2147483648, %v329_v45  ;;  %v340_v23 = vand.u32 2147483647, %v329_v45  ;;  %vm336_vm4 = vweird.f32 %v329_v45 }
 0x258   :  { %v343_v52 = vor.u32 1.1754944e-38, %v342_v49  ;;  %vm341_vm6 = vcmp.eq.f32.partialorder %v340_v23, 8.507059e+37 }
 0x25c   :  { %v462_v46 = vpop.eup %461 }
 0x25d   :  { %v332_v47 = vmul.f32 %v462_v46, %v329_v45  ;;  %vm337_vm3 = vweird.f32 %v462_v46 }
 0x25e   :  { %vm338_vm5 = vmor %vm336_vm4, %vm337_vm3 }
 0x25f   :  { %v333_v48 = vsub.f32 1.0, %v332_v47 }
 0x261   :  { %v334_v50 = vmul.f32 %v462_v46, %v333_v48 }
 0x263   :  { %v335_v51 = vadd.f32 %v462_v46, %v334_v50 }
 0x265   :  { %v339_v53 = vsel %vm338_vm5, %v462_v46, %v335_v51 }
 0x266   :  { %v344_v16 = vsel %vm341_vm6, %v343_v52, %v339_v53 }
 0x267   :  { %v371_v55 = vmul.f32 %v366_v54, %v344_v16 }
 0x268   :  { %v318_v56 = vpop.permute.xlu0 %317 }
 0x269   :  { %v322_v57 = vadd.f32 %v318_v56, %v709_v20  ;;  %375 = vrot.lane.b32.xlu0 %v371_v55, %s626_s4  ;;  %v368_v20 = vpop.permute.xlu2 %367 }
 0x26b   :  { %v416_v58 = vmul.f32 -1.442695, %v322_v57 }
 0x26d   :  { %463 = vpow2.f32 %v416_v58 }
 0x273   :  { %v464_v59 = vpop.eup %463 }
 0x274   :  { %v330_v60 = vadd.f32 1.0, %v464_v59 }
 0x276   :  { %465 = vrcp.f32 %v330_v60  ;;  %v357_v0 = vand.u32 2147483648, %v330_v60  ;;  %v355_v2 = vand.u32 2147483647, %v330_v60  ;;  %vm351_vm8 = vweird.f32 %v330_v60 }
 0x278   :  { %v358_v4 = vor.u32 1.1754944e-38, %v357_v0  ;;  %vm356_vm10 = vcmp.eq.f32.partialorder %v355_v2, 8.507059e+37 }
 0x27c   :  { %v466_v61 = vpop.eup %465 }
 0x27d   :  { %v347_v62 = vmul.f32 %v466_v61, %v330_v60  ;;  %vm352_vm7 = vweird.f32 %v466_v61 }
 0x27e   :  { %vm353_vm9 = vmor %vm351_vm8, %vm352_vm7 }
 0x27f   :  { %v348_v63 = vsub.f32 1.0, %v347_v62 }
 0x281   :  { %v349_v1 = vmul.f32 %v466_v61, %v348_v63 }
 0x283   :  { %v350_v3 = vadd.f32 %v466_v61, %v349_v1 }
 0x285   :  { %v354_v5 = vsel %vm353_vm9, %v466_v61, %v350_v3 }
 0x286   :  { %v359_v6 = vsel %vm356_vm10, %v358_v4, %v354_v5 }
 0x287   :  { %v372_v7 = vmul.f32 %v368_v20, %v359_v6 }
 0x289   :  { %377 = vrot.lane.b32.xlu1 %v372_v7, %s626_s4 }
 0x2db   :  { %v376_v8 = vpop.permute.xlu0 %375 }
 0x2dc   :  { %v381_v9 = vsel %vm119_vm1, %v376_v8, %v729_v29 }
 0x2dd   :  { %384 = vst.msk [vmem:[#allocation11] sm:$0xff] %vm383_vm11, %v381_v9 }
 0x2fb   :  { %v378_v10 = vpop.permute.xlu1 %377 }
 0x2fc   :  { %v382_v11 = vsel %vm119_vm1, %v378_v10, %v733_v34 }
 0x2fd   :  { %385 = vst.msk [vmem:[#allocation11 + $0x8] sm:$0xff] %vm383_vm11, %v382_v11 }
 0x2fe   :  { %398 = dma.vmem_to_hbm [thread:$0]  %s391_s28, 256, %s393_s8, [#allocation4], %s620_s9, %s620_s9, %s621_s10  }
 0x2ff   :  { %617 = dma.done.wait [#allocation4], 256  }
 0x300   :  { %618 = vsyncadd [#allocation4], 4294967040 }
 0x301   :  { %403 = vsyncpa [#allocation3], 1 }
 0x302   :  { %404 = vsyncpa [#allocation6], 1 }
 0x303   :  { %405 = vsyncpa [#allocation9], 1 }
 0x304   :  { %406 = vsyncpa [#allocation4], 1 }

</bundles_post_ra>
